<compile_context>
chip_gen: v7x
topology: tpu7x:2x2x1
jax: 0.10.0
libtpu: 0.0.40
codegen_flags: <defaults>
</compile_context>

<pallas_src>
import functools

import jax
import jax.numpy as jnp
from jax.experimental import pallas as pl
from jax.experimental.pallas import tpu as pltpu


def _round_up(v, m):
    return ((v + m - 1) // m) * m


def gcn_layer_kernel(a_ref, x_ref, w_ref, b_ref, o_ref, acc_ref, *, apply_relu):
    """One GCNConv layer tile:  o[i] = act( (sum_k Â[i,k] @ X[k]) @ W + b )."""
    k = pl.program_id(1)

    @pl.when(k == 0)
    def _():
        acc_ref[...] = jnp.zeros_like(acc_ref)

    # Accumulate the aggregation term (Â @ X): bf16 MXU inputs, f32 accumulate.
    acc_ref[...] += jnp.dot(a_ref[...], x_ref[...],
                            preferred_element_type=jnp.float32)

    @pl.when(k == pl.num_programs(1) - 1)
    def _():
        agg = acc_ref[...].astype(w_ref.dtype)
        out = jnp.dot(agg, w_ref[...], preferred_element_type=jnp.float32)
        out = out + b_ref[...]
        if apply_relu:
            out = jnp.maximum(out, 0.0)
        o_ref[...] = out.astype(o_ref.dtype)


def gcn_layer(a_bf16, x_bf16, w_bf16, b_f32, *, apply_relu, tm=256, tk=256):
    """Tiled GCNConv layer on padded operands (all dims multiples of tm/tk/128)."""
    n_pad = a_bf16.shape[0]
    fin_pad = x_bf16.shape[1]
    fout_pad = w_bf16.shape[1]
    assert n_pad % tm == 0 and n_pad % tk == 0
    grid = (n_pad // tm, n_pad // tk)

    flops = 2 * n_pad * n_pad * fin_pad + 2 * n_pad * fin_pad * fout_pad
    bytes_accessed = (a_bf16.size * 2 + x_bf16.size * 2 + w_bf16.size * 2
                      + b_f32.size * 4 + n_pad * fout_pad * 4)

    kernel = functools.partial(gcn_layer_kernel, apply_relu=apply_relu)
    return pl.pallas_call(
        kernel,
        out_shape=jax.ShapeDtypeStruct((n_pad, fout_pad), jnp.float32),
        grid_spec=pltpu.PrefetchScalarGridSpec(
            num_scalar_prefetch=0,
            grid=grid,
            in_specs=[
                pl.BlockSpec((tm, tk), lambda i, k: (i, k)),          # Â tile
                pl.BlockSpec((tk, fin_pad), lambda i, k: (k, 0)),     # X tile
                pl.BlockSpec((fin_pad, fout_pad), lambda i, k: (0, 0)),  # W (resident)
                pl.BlockSpec((1, fout_pad), lambda i, k: (0, 0)),     # bias
            ],
            out_specs=pl.BlockSpec((tm, fout_pad), lambda i, k: (i, 0)),
            scratch_shapes=[pltpu.VMEM((tm, fin_pad), jnp.float32)],
        ),
        compiler_params=pltpu.CompilerParams(
            dimension_semantics=("parallel", "arbitrary"),
            vmem_limit_bytes=32 * 1024 * 1024,
        ),
        cost_estimate=pl.CostEstimate(flops=flops, transcendentals=0,
                                      bytes_accessed=bytes_accessed),
    )(a_bf16, x_bf16, w_bf16, b_f32)


def _pad2d(arr, rows, cols):
    return jnp.pad(arr, ((0, rows - arr.shape[0]), (0, cols - arr.shape[1])))


def gcn_net_forward(a_norm, x, w1, b1, w2, b2, *, tm=256, tk=256):
    """2-layer GCN forward (eval mode: dropout == identity)."""
    n, f_in = x.shape
    nhid = w1.shape[1]
    nout = w2.shape[1]

    n_pad = _round_up(n, max(tm, tk))
    f_pad = _round_up(f_in, 128)
    h_pad = _round_up(nhid, 128)
    o_pad = _round_up(nout, 128)

    # Zero-pad to lane/tile-aligned shapes; cast MXU operands to bf16.
    a_p = _pad2d(a_norm, n_pad, n_pad).astype(jnp.bfloat16)
    x_p = _pad2d(x, n_pad, f_pad).astype(jnp.bfloat16)
    w1_p = _pad2d(w1, f_pad, h_pad).astype(jnp.bfloat16)
    b1_p = _pad2d(b1.reshape(1, -1), 1, h_pad).astype(jnp.float32)
    w2_p = _pad2d(w2, h_pad, o_pad).astype(jnp.bfloat16)
    b2_p = _pad2d(b2.reshape(1, -1), 1, o_pad).astype(jnp.float32)

    # Layer 1: relu((Â X) W1 + b1)
    h = gcn_layer(a_p, x_p, w1_p, b1_p, apply_relu=True, tm=tm, tk=tk)
    # F.dropout(x, p, training=self.training): module run in eval mode -> identity.
    # TODO(synk): for training-mode dropout, draw a Bernoulli mask in-kernel with
    # pltpu.prng_seed / pltpu.stateful_bernoulli and rescale by 1/(1-p).
    # Layer 2: (Â h) W2 + b2
    y = gcn_layer(a_p, h.astype(jnp.bfloat16), w2_p, b2_p,
                  apply_relu=False, tm=tm, tk=tk)
    return y[:n, :nout]


def build_normalized_adjacency(edge_index, num_nodes):
    """Dense Â = D^{-1/2}(A + I_remaining)D^{-1/2} from a (2, E) int edge_index."""
    src, dst = edge_index[0], edge_index[1]
    a = jnp.zeros((num_nodes, num_nodes), jnp.float32)
    # message flows src -> dst  =>  A[dst, src] += 1  (scatter-ADD so duplicate
    # edges accumulate, matching PyG scatter semantics).
    a = a.at[dst, src].add(1.0)
    # add_remaining_self_loops: unit self-loop only where none already exists.
    diag = jnp.diagonal(a)
    a = a + jnp.diag(jnp.where(diag > 0.0, 0.0, 1.0))
    deg = a.sum(axis=1)
    d_inv_sqrt = jnp.where(deg > 0, 1.0 / jnp.sqrt(deg), 0.0)
    return d_inv_sqrt[:, None] * a * d_inv_sqrt[None, :]
    # TODO(synk): for large sparse graphs, replace this dense O(N^2) Â with an
    # edge-gather formulation (PrefetchScalarGridSpec scalar-prefetched offsets).


if __name__ == "__main__":
    # Shapes consistent with the module defaults: nhid=50, nout=50, num_edge=3.
    num_nodes = 31
    num_features = 12
    nhid = 50
    nout = 50

    key = jax.random.PRNGKey(0)
    k_x, k_w1, k_b1, k_w2, k_b2 = jax.random.split(key, 5)

    x = jax.random.normal(k_x, (num_nodes, num_features), dtype=jnp.float32)

    # Deterministic edge_index: node i -> (i+1)%N, (i+2)%N, (i+3)%N (num_edge=3).
    src = jnp.repeat(jnp.arange(num_nodes), 3)
    dst = (src + jnp.tile(jnp.arange(1, 4), num_nodes)) % num_nodes
    edge_index = jnp.stack([src, dst], axis=0).astype(jnp.int32)

    a_norm = build_normalized_adjacency(edge_index, num_nodes)

    # GCNConv linear is bias-free; the per-conv bias is added after aggregation.
    w1 = jax.random.normal(k_w1, (num_features, nhid), jnp.float32) / jnp.sqrt(
        float(num_features))
    b1 = 0.1 * jax.random.normal(k_b1, (nhid,), jnp.float32)
    w2 = jax.random.normal(k_w2, (nhid, nout), jnp.float32) / jnp.sqrt(float(nhid))
    b2 = 0.1 * jax.random.normal(k_b2, (nout,), jnp.float32)

    out = gcn_net_forward(a_norm, x, w1, b1, w2, b2)
    out = jax.block_until_ready(out)

    # Pure-JAX f32 reference (same math, outside Pallas).
    ref = jnp.maximum(a_norm @ (x @ w1) + b1[None, :], 0.0)
    ref = a_norm @ (ref @ w2) + b2[None, :]

    assert out.shape == (num_nodes, nout)
    max_err = float(jnp.max(jnp.abs(out - ref)))
    assert jnp.allclose(out, ref, atol=5e-2, rtol=5e-2), max_err

    print("KERNEL_OK")
</pallas_src>

<mosaic_0001>
module attributes {stable_mosaic.version = 11 : i64} {
  func.func @gcn_layer_kernel(%arg0: i32, %arg1: i32, %arg2: memref<256x256xbf16, #tpu.memory_space<vmem>>, %arg3: memref<256x128xbf16, #tpu.memory_space<vmem>>, %arg4: memref<128x128xbf16, #tpu.memory_space<vmem>>, %arg5: memref<1x128xf32, #tpu.memory_space<vmem>>, %arg6: memref<256x128xf32, #tpu.memory_space<vmem>>, %arg7: memref<256x128xf32, #tpu.memory_space<vmem>>) attributes {dimension_semantics = [#tpu.dimension_semantics<parallel>, #tpu.dimension_semantics<arbitrary>], iteration_bounds = array<i64: 1, 1>, scalar_prefetch = 0 : i64, scratch_operands = 1 : i64, tpu.core_type = #tpu.core_type<tc>, window_params = [{transform_indices = @transform_0, window_bounds = array<i64: 256, 256>}, {transform_indices = @transform_1, window_bounds = array<i64: 256, 128>}, {pipeline_mode = #tpu.pipeline_mode<synchronous>, transform_indices = @transform_2, window_bounds = array<i64: 128, 128>}, {pipeline_mode = #tpu.pipeline_mode<synchronous>, transform_indices = @transform_3, window_bounds = array<i64: 1, 128>}, {transform_indices = @transform_4, window_bounds = array<i64: 256, 128>}]} {
    %c0_i32 = arith.constant 0 : i32
    %0 = arith.cmpi eq, %arg1, %c0_i32 : i32
    %1 = arith.extui %0 : i1 to i32
    %c0_i32_0 = arith.constant 0 : i32
    %2 = arith.cmpi ne, %1, %c0_i32_0 : i32
    scf.if %2 {
      %cst_10 = arith.constant 0.000000e+00 : f32
      %12 = vector.broadcast %cst_10 : f32 to vector<256x128xf32>
      %c0_11 = arith.constant 0 : index
      %c0_12 = arith.constant 0 : index
      %13 = vector.load %arg7[%c0_11, %c0_12] : memref<256x128xf32, #tpu.memory_space<vmem>>, vector<256x128xf32>
      tpu.vector_store %arg7[%c0_11, %c0_12], %12 {strides = array<i32>} : memref<256x128xf32, #tpu.memory_space<vmem>>, vector<256x128xf32>,
    } else {
    }
    %c0 = arith.constant 0 : index
    %c0_1 = arith.constant 0 : index
    %3 = vector.load %arg7[%c0, %c0_1] : memref<256x128xf32, #tpu.memory_space<vmem>>, vector<256x128xf32>
    %c0_2 = arith.constant 0 : index
    %c0_3 = arith.constant 0 : index
    %4 = vector.load %arg2[%c0_2, %c0_3] : memref<256x256xbf16, #tpu.memory_space<vmem>>, vector<256x256xbf16>
    %c0_4 = arith.constant 0 : index
    %c0_5 = arith.constant 0 : index
    %5 = vector.load %arg3[%c0_4, %c0_5] : memref<256x128xbf16, #tpu.memory_space<vmem>>, vector<256x128xbf16>
    %cst = arith.constant dense<0.000000e+00> : vector<256x128xf32>
    %6 = tpu.matmul %4, %5, %cst {dimension_numbers = #tpu.dot_dimension_numbers<[1], [0], [0], [1], [0, 0, 1, 1], [], []>} : vector<256x256xbf16>, vector<256x128xbf16>, vector<256x128xf32> -> vector<256x128xf32>
    %7 = arith.addf %3, %6 : vector<256x128xf32>
    %c0_6 = arith.constant 0 : index
    %c0_7 = arith.constant 0 : index
    %8 = vector.load %arg7[%c0_6, %c0_7] : memref<256x128xf32, #tpu.memory_space<vmem>>, vector<256x128xf32>
    tpu.vector_store %arg7[%c0_6, %c0_7], %7 {strides = array<i32>} : memref<256x128xf32, #tpu.memory_space<vmem>>, vector<256x128xf32>,
    %c0_i32_8 = arith.constant 0 : i32
    %9 = arith.cmpi eq, %arg1, %c0_i32_8 : i32
    %10 = arith.extui %9 : i1 to i32
    %c0_i32_9 = arith.constant 0 : i32
    %11 = arith.cmpi ne, %10, %c0_i32_9 : i32
    scf.if %11 {
      %c0_10 = arith.constant 0 : index
      %c0_11 = arith.constant 0 : index
      %12 = vector.load %arg7[%c0_10, %c0_11] : memref<256x128xf32, #tpu.memory_space<vmem>>, vector<256x128xf32>
      %13 = arith.truncf %12 : vector<256x128xf32> to vector<256x128xbf16>
      %c0_12 = arith.constant 0 : index
      %c0_13 = arith.constant 0 : index
      %14 = vector.load %arg4[%c0_12, %c0_13] : memref<128x128xbf16, #tpu.memory_space<vmem>>, vector<128x128xbf16>
      %cst_14 = arith.constant dense<0.000000e+00> : vector<256x128xf32>
      %15 = tpu.matmul %13, %14, %cst_14 {dimension_numbers = #tpu.dot_dimension_numbers<[1], [0], [0], [1], [0, 0, 1, 1], [], []>} : vector<256x128xbf16>, vector<128x128xbf16>, vector<256x128xf32> -> vector<256x128xf32>
      %c0_15 = arith.constant 0 : index
      %c0_16 = arith.constant 0 : index
      %16 = vector.load %arg5[%c0_15, %c0_16] : memref<1x128xf32, #tpu.memory_space<vmem>>, vector<1x128xf32>
      %17 = vector.broadcast %16 : vector<1x128xf32> to vector<256x128xf32>
      %18 = arith.addf %15, %17 : vector<256x128xf32>
      %cst_17 = arith.constant 0.000000e+00 : f32
      %19 = vector.broadcast %cst_17 : f32 to vector<256x128xf32>
      %20 = arith.maximumf %18, %19 : vector<256x128xf32>
      %c0_18 = arith.constant 0 : index
      %c0_19 = arith.constant 0 : index
      %21 = vector.load %arg6[%c0_18, %c0_19] : memref<256x128xf32, #tpu.memory_space<vmem>>, vector<256x128xf32>
      tpu.vector_store %arg6[%c0_18, %c0_19], %20 {strides = array<i32>} : memref<256x128xf32, #tpu.memory_space<vmem>>, vector<256x128xf32>,
    } else {
    }
    return
  }
  func.func @transform_0(%arg0: i32, %arg1: i32) -> (i32, i32) {
    %c0_i32 = arith.constant 0 : i32
    return %arg0, %arg1 : i32, i32
  }
  func.func @transform_1(%arg0: i32, %arg1: i32) -> (i32, i32) {
    %c0_i32 = arith.constant 0 : i32
    %c0_i32_0 = arith.constant 0 : i32
    return %arg1, %c0_i32 : i32, i32
  }
  func.func @transform_2(%arg0: i32, %arg1: i32) -> (i32, i32) {
    %c0_i32 = arith.constant 0 : i32
    %c0_i32_0 = arith.constant 0 : i32
    %c0_i32_1 = arith.constant 0 : i32
    return %c0_i32, %c0_i32_0 : i32, i32
  }
  func.func @transform_3(%arg0: i32, %arg1: i32) -> (i32, i32) {
    %c0_i32 = arith.constant 0 : i32
    %c0_i32_0 = arith.constant 0 : i32
    %c0_i32_1 = arith.constant 0 : i32
    return %c0_i32, %c0_i32_0 : i32, i32
  }
  func.func @transform_4(%arg0: i32, %arg1: i32) -> (i32, i32) {
    %c0_i32 = arith.constant 0 : i32
    %c0_i32_0 = arith.constant 0 : i32
    return %arg0, %c0_i32 : i32, i32
  }
}

</mosaic_0001>

<bundles_post_ra>
// kernel: tpu_custom_call.1
= control target key start
LH: loop header
LB: loop body
LE: loop exit
PB: predicated region body
PF: predicated region fallthrough
CT: control target
= control target key end

     0   :  { %9 = vsyncpa [#allocation4], 0  ;;  %s1635_s0 = inlined_call_operand.hbm [shape: bf16[256,256], index: 0, kind: input, shape index: {}]   ;;  %s1636_s1 = inlined_call_operand.hbm [shape: bf16[256,128], index: 1, kind: input, shape index: {}]   ;;  %s1637_s2 = inlined_call_operand.hbm [shape: bf16[128,128], index: 2, kind: input, shape index: {}]   ;;  %s1638_s3 = inlined_call_operand.vmem [shape: f32[1,128], index: 3, kind: input, shape index: {}]   ;;  %s1639_s4 = inlined_call_operand.hbm [shape: f32[256,128], index: 4, kind: output, shape index: {}]  }
   0x1   :  { %10 = vsyncpa [#allocation7], 0 }
   0x2   :  { %11 = vsyncpa [#allocation5], 0  ;;  %s1469_s15 = smov [#allocation6]   ;;  %s1375_s19 = scalar_lea.hbm %s1636_s1, 2048 }
   0x3   :  { %s29_s16 = sshll.u32 %s1469_s15, 4  ;;  %p1376_p0 = scmp.ne.s32.totalorder %s1636_s1, %s1375_s19  ;;  %s30_s16 = int_to_ptr.vmem [resolvable:$true] %s29_s16 }
   0x4   :  { %p1379_p1 = scmp.lt.u32.totalorder %s1375_s19, %s1636_s1 }
   0x6   :  { %p1381_p2 = pnand %p1379_p1, %p1376_p0 }
   0x8   :  { %1384 = shalt.err (!%p1381_p2)
}
   0x9   :  { %s1385_s24 = scalar_lea.vmem %s30_s16, 2048  ;;  %p1390_p4 = scmp.lt.s32.totalorder %s30_s16, %s30_s16 }
   0xa   :  { %p1386_p3 = scmp.ne.s32.totalorder %s30_s16, %s1385_s24  ;;  %p1391_p5 = scmp.lt.s32.totalorder %s1385_s24, %s1385_s24 }
   0xc   :  { %p1392_p6 = por %p1391_p5, %p1390_p4 }
   0xe   :  { %p1393_p7 = pnand %p1392_p6, %p1386_p3 }
  0x10   :  { %1396 = shalt.err (!%p1393_p7)
}
  0x11   :  { %s1470_s25 = smov 64   ;;  %s1471_s26 = smov 4  }
  0x12   :  { %35 = dma.hbm_to_vmem [thread:$0]  %s1636_s1, 2048, %s30_s16, [#allocation7], %s1470_s25, %s1470_s25, %s1471_s26  }
  0x13   :  { %s1472_s29 = smov [#allocation3]   ;;  %s1397_s7 = scalar_lea.hbm %s1635_s0, 4096 }
  0x14   :  { %s17_s30 = sshll.u32 %s1472_s29, 4  ;;  %p1398_p8 = scmp.ne.s32.totalorder %s1635_s0, %s1397_s7  ;;  %s18_s30 = int_to_ptr.vmem [resolvable:$true] %s17_s30 }
  0x15   :  { %p1401_p9 = scmp.lt.u32.totalorder %s1397_s7, %s1635_s0 }
  0x17   :  { %p1403_p10 = pnand %p1401_p9, %p1398_p8 }
  0x19   :  { %1406 = shalt.err (!%p1403_p10)
}
  0x1a   :  { %s1407_s12 = scalar_lea.vmem %s18_s30, 4096  ;;  %p1412_p12 = scmp.lt.s32.totalorder %s18_s30, %s18_s30 }
  0x1b   :  { %p1408_p11 = scmp.ne.s32.totalorder %s18_s30, %s1407_s12  ;;  %p1413_p13 = scmp.lt.s32.totalorder %s1407_s12, %s1407_s12 }
  0x1d   :  { %p1414_p0 = por %p1413_p13, %p1412_p12 }
  0x1f   :  { %p1415_p1 = pnand %p1414_p0, %p1408_p11 }
  0x21   :  { %1418 = shalt.err (!%p1415_p1)
}
  0x22   :  { %s1473_s1 = smov 128   ;;  %s1474_s13 = smov 8  }
  0x23   :  { %23 = dma.hbm_to_vmem [thread:$0]  %s1635_s0, 4096, %s18_s30, [#allocation4], %s1473_s1, %s1473_s1, %s1474_s13  }
  0x24   :  { %s1475_s16 = smov [#allocation8]   ;;  %s1419_s20 = scalar_lea.hbm %s1637_s2, 1024 }
  0x25   :  { %s41_s17 = sshll.u32 %s1475_s16, 4  ;;  %p1420_p2 = scmp.ne.s32.totalorder %s1637_s2, %s1419_s20  ;;  %s42_s17 = int_to_ptr.vmem [resolvable:$true] %s41_s17 }
  0x26   :  { %p1423_p3 = scmp.lt.u32.totalorder %s1419_s20, %s1637_s2 }
  0x28   :  { %p1425_p4 = pnand %p1423_p3, %p1420_p2 }
  0x2a   :  { %1428 = shalt.err (!%p1425_p4)
}
  0x2b   :  { %s1429_s27 = scalar_lea.vmem %s42_s17, 1024  ;;  %p1434_p6 = scmp.lt.s32.totalorder %s42_s17, %s42_s17 }
  0x2c   :  { %p1430_p5 = scmp.ne.s32.totalorder %s42_s17, %s1429_s27  ;;  %p1435_p7 = scmp.lt.s32.totalorder %s1429_s27, %s1429_s27 }
  0x2e   :  { %p1436_p8 = por %p1435_p7, %p1434_p6 }
  0x30   :  { %p1437_p9 = pnand %p1436_p8, %p1430_p5 }
  0x32   :  { %1440 = shalt.err (!%p1437_p9)
}
  0x33   :  { %47 = dma.hbm_to_vmem [thread:$0]  %s1637_s2, 1024, %s42_s17, [#allocation7], %s1470_s25, %s1470_s25, %s1471_s26  }
  0x34   :  { %1463 = dma.done.wait [#allocation4], 4096  }
  0x35   :  { %1464 = vsyncadd [#allocation4], 4294963200 }
  0x36   :  { %1465 = dma.done.wait [#allocation7], 3072  }
  0x37   :  { %1466 = vsyncadd [#allocation7], 4294964224  ;;  %v1303_v0 = vld [vmem:[#allocation6 + $0x40] sm:$0xff]   ;;  %v1305_v2 = vld [vmem:[#allocation6 + $0x48] sm:$0xff]  }
  0x38   :  { %v1304_v1 = vld [vmem:[#allocation6] sm:$0xff]   ;;  %1095 = vmatprep.subr.bf16.mxu0 %v1303_v0  ;;  %1279 = vmatprep.subr.bf16.mxu1 %v1303_v0  ;;  %v1306_v3 = vld [vmem:[#allocation6 + $0x8] sm:$0xff]   ;;  %v1307_v4 = vld [vmem:[#allocation6 + $0x50] sm:$0xff]  }
  0x39   :  { %1096 = vmatpush3.bf16.msra.mxu0 %v1304_v1  ;;  %1287 = vmatpush3.bf16.msra.mxu1 %v1304_v1  ;;  %v1308_v5 = vld [vmem:[#allocation6 + $0x10] sm:$0xff]   ;;  %v1309_v6 = vld [vmem:[#allocation6 + $0x58] sm:$0xff]   ;;  %v1311_v8 = vld [vmem:[#allocation6 + $0x60] sm:$0xff]  }
  0x3a   :  { %1097 = vmatprep.subr.bf16.mxu0 %v1305_v2  ;;  %1280 = vmatprep.subr.bf16.mxu1 %v1305_v2  ;;  %v1310_v7 = vld [vmem:[#allocation6 + $0x18] sm:$0xff]   ;;  %v1312_v9 = vld [vmem:[#allocation6 + $0x20] sm:$0xff]   ;;  %v1313_v10 = vld [vmem:[#allocation6 + $0x68] sm:$0xff]  }
  0x3b   :  { %v1321_v11 = vld [vmem:[#allocation3 + $0x4] ss:$8 sps:$4 sm:$0xff]   ;;  %v1315_v13 = vld [vmem:[#allocation6 + $0x70] sm:$0xff]   ;;  %v1317_v15 = vld [vmem:[#allocation6 + $0x78] sm:$0xff]  }
  0x3c   :  { %v1314_v12 = vld [vmem:[#allocation6 + $0x28] sm:$0xff]   ;;  %480 = vmatprep.mubr.bf16.mxu0 %v1321_v11  ;;  %v1316_v14 = vld [vmem:[#allocation6 + $0x30] sm:$0xff]   ;;  %v1318_v16 = vld [vmem:[#allocation6 + $0x38] sm:$0xff]  }
  0x3d   :  { %1098 = vmatpush3.bf16.msra.mxu0 %v1306_v3  ;;  %1288 = vmatpush3.bf16.msra.mxu1 %v1306_v3  ;;  %v1319_v17 = vld [vmem:[#allocation3] ss:$8 sps:$4 sm:$0xff]   ;;  %v1351_v18 = vld [vmem:[#allocation3 + $0xc4] ss:$8 sps:$4 sm:$0xff]   ;;  %v1322_v19 = vld [vmem:[#allocation3 + $0x14] ss:$8 sps:$4 sm:$0xff]  }
  0x3e   :  { %1099 = vmatprep.subr.bf16.mxu0 %v1307_v4  ;;  %1281 = vmatprep.subr.bf16.mxu1 %v1307_v4  ;;  %v1349_v20 = vld [vmem:[#allocation3 + $0xc0] ss:$8 sps:$4 sm:$0xff]   ;;  %v1355_v21 = vld [vmem:[#allocation3 + $0xd4] ss:$8 sps:$4 sm:$0xff]   ;;  %v1324_v22 = vld [vmem:[#allocation3 + $0x10] ss:$8 sps:$4 sm:$0xff]  }
  0x3f   :  { %576 = vmatprep.mubr.bf16.mxu1 %v1351_v18  ;;  %v1325_v23 = vld [vmem:[#allocation3 + $0x24] ss:$8 sps:$4 sm:$0xff]   ;;  %v1357_v24 = vld [vmem:[#allocation3 + $0xd0] ss:$8 sps:$4 sm:$0xff]   ;;  %v1327_v29 = vld [vmem:[#allocation3 + $0x20] ss:$8 sps:$4 sm:$0xff]  }
  0x40   :  { %v1367_v25 = vld [vmem:[#allocation8] sm:$0xff]   ;;  %v1368_v26 = vld [vmem:[#allocation8 + $0x8] sm:$0xff]   ;;  %v1369_v28 = vld [vmem:[#allocation8 + $0x10] sm:$0xff]  }
  0x41   :  { %1100 = vmatpush3.bf16.msra.mxu0 %v1308_v5  ;;  %1289 = vmatpush3.bf16.msra.mxu1 %v1308_v5  ;;  %v1361_v27 = vld [vmem:[#allocation3 + $0xe4] ss:$8 sps:$4 sm:$0xff]   ;;  %v1370_v30 = vld [vmem:[#allocation8 + $0x18] sm:$0xff]   ;;  %v1363_v32 = vld [vmem:[#allocation3 + $0xe0] ss:$8 sps:$4 sm:$0xff]  }
  0x42   :  { %1101 = vmatprep.subr.bf16.mxu0 %v1309_v6  ;;  %1282 = vmatprep.subr.bf16.mxu1 %v1309_v6  ;;  %v1328_v31 = vld [vmem:[#allocation3 + $0x34] ss:$8 sps:$4 sm:$0xff]   ;;  %v1330_v34 = vld [vmem:[#allocation3 + $0x30] ss:$8 sps:$4 sm:$0xff]   ;;  %v1331_v35 = vld [vmem:[#allocation3 + $0x44] ss:$8 sps:$4 sm:$0xff]  }
  0x43   :  { %v1364_v33 = vld [vmem:[#allocation3 + $0xf4] ss:$8 sps:$4 sm:$0xff]   ;;  %v1366_v36 = vld [vmem:[#allocation3 + $0xf0] ss:$8 sps:$4 sm:$0xff]   ;;  %v1333_v37 = vld [vmem:[#allocation3 + $0x40] ss:$8 sps:$4 sm:$0xff]  }
  0x44   :  { %v1334_v38 = vld [vmem:[#allocation3 + $0x54] ss:$8 sps:$4 sm:$0xff]   ;;  %v1336_v39 = vld [vmem:[#allocation3 + $0x50] ss:$8 sps:$4 sm:$0xff]   ;;  %v1337_v40 = vld [vmem:[#allocation3 + $0x64] ss:$8 sps:$4 sm:$0xff]  }
  0x45   :  { %1102 = vmatpush3.bf16.msra.mxu0 %v1310_v7  ;;  %1290 = vmatpush3.bf16.msra.mxu1 %v1310_v7  ;;  %v1339_v41 = vld [vmem:[#allocation3 + $0x60] ss:$8 sps:$4 sm:$0xff]   ;;  %v1340_v42 = vld [vmem:[#allocation3 + $0x74] ss:$8 sps:$4 sm:$0xff]   ;;  %v1342_v43 = vld [vmem:[#allocation3 + $0x70] ss:$8 sps:$4 sm:$0xff]  }
  0x46   :  { %1103 = vmatprep.subr.bf16.mxu0 %v1311_v8  ;;  %1283 = vmatprep.subr.bf16.mxu1 %v1311_v8  ;;  %v1343_v44 = vld [vmem:[#allocation3 + $0x84] ss:$8 sps:$4 sm:$0xff]   ;;  %v1345_v45 = vld [vmem:[#allocation3 + $0x80] ss:$8 sps:$4 sm:$0xff]   ;;  %v1346_v46 = vld [vmem:[#allocation3 + $0x94] ss:$8 sps:$4 sm:$0xff]  }
  0x47   :  { %v1348_v47 = vld [vmem:[#allocation3 + $0x90] ss:$8 sps:$4 sm:$0xff]   ;;  %v1352_v48 = vld [vmem:[#allocation3 + $0xa4] ss:$8 sps:$4 sm:$0xff]   ;;  %v1354_v49 = vld [vmem:[#allocation3 + $0xa0] ss:$8 sps:$4 sm:$0xff]  }
  0x48   :  { %v1358_v50 = vld [vmem:[#allocation3 + $0xb4] ss:$8 sps:$4 sm:$0xff]   ;;  %v1371_v51 = vld [vmem:[#allocation8 + $0x20] sm:$0xff]   ;;  %v1360_v52 = vld [vmem:[#allocation3 + $0xb0] ss:$8 sps:$4 sm:$0xff]  }
  0x49   :  { %1104 = vmatpush3.bf16.msra.mxu0 %v1312_v9  ;;  %1291 = vmatpush3.bf16.msra.mxu1 %v1312_v9  ;;  %v1372_v53 = vld [vmem:[#allocation8 + $0x28] sm:$0xff]   ;;  %v1373_v54 = vld [vmem:[#allocation8 + $0x30] sm:$0xff]   ;;  %v1374_v55 = vld [vmem:[#allocation8 + $0x38] sm:$0xff]  }
  0x4a   :  { %1105 = vmatprep.subr.bf16.mxu0 %v1313_v10  ;;  %1284 = vmatprep.subr.bf16.mxu1 %v1313_v10 }
  0x4d   :  { %1106 = vmatpush3.bf16.msra.mxu0 %v1314_v12  ;;  %1292 = vmatpush3.bf16.msra.mxu1 %v1314_v12 }
  0x4e   :  { %1107 = vmatprep.subr.bf16.mxu0 %v1315_v13  ;;  %1285 = vmatprep.subr.bf16.mxu1 %v1315_v13 }
  0x51   :  { %1108 = vmatpush3.bf16.msra.mxu0 %v1316_v14  ;;  %1293 = vmatpush3.bf16.msra.mxu1 %v1316_v14 }
  0x52   :  { %1109 = vmatprep.subr.bf16.mxu0 %v1317_v15  ;;  %1286 = vmatprep.subr.bf16.mxu1 %v1317_v15 }
  0x55   :  { %1110 = vmatpush3.bf16.msra.mxu0 %v1318_v16  ;;  %1294 = vmatpush3.bf16.msra.mxu1 %v1318_v16 }
  0x56   :  { %1231 = vmatprep.subr.bf16.mxu1 %v1367_v25 }
  0x58   :  { %481 = vmatmul.mubr.bf16.vlgmr.msra.gmra.mrb[0].mxu0 %v1319_v17  ;;  %577 = vmatmul.mubr.bf16.vlgmr.msra.gmra.mrb[0].mxu1 %v1349_v20 }
  0x59   :  { %488 = vmatprep.mubr.bf16.mxu0 %v1322_v19  ;;  %584 = vmatprep.mubr.bf16.mxu1 %v1355_v21 }
  0x5a   :  { %1232 = vmatpush3.bf16.msra.mxu1 %v1367_v25 }
  0x5b   :  { %1233 = vmatprep.subr.bf16.mxu1 %v1368_v26 }
  0x5e   :  { %1234 = vmatpush3.bf16.msra.mxu1 %v1368_v26 }
  0x5f   :  { %1235 = vmatprep.subr.bf16.mxu1 %v1369_v28 }
  0x60   :  { %489 = vmatmul.mubr.bf16.gmra.mrb[4].mxu0 %v1324_v22  ;;  %585 = vmatmul.mubr.bf16.gmra.mrb[4].mxu1 %v1357_v24 }
  0x61   :  { %496 = vmatprep.mubr.bf16.mxu0 %v1325_v23  ;;  %592 = vmatprep.mubr.bf16.mxu1 %v1361_v27 }
  0x62   :  { %1236 = vmatpush3.bf16.msra.mxu1 %v1369_v28 }
  0x63   :  { %1237 = vmatprep.subr.bf16.mxu1 %v1370_v30 }
  0x66   :  { %1238 = vmatpush3.bf16.msra.mxu1 %v1370_v30 }
  0x67   :  { %1239 = vmatprep.subr.bf16.mxu1 %v1371_v51 }
  0x68   :  { %497 = vmatmul.mubr.bf16.gmra.mrb[8].mxu0 %v1327_v29  ;;  %593 = vmatmul.mubr.bf16.gmra.mrb[8].mxu1 %v1363_v32 }
  0x69   :  { %504 = vmatprep.mubr.bf16.mxu0 %v1328_v31  ;;  %600 = vmatprep.mubr.bf16.mxu1 %v1364_v33 }
  0x6a   :  { %1240 = vmatpush3.bf16.msra.mxu1 %v1371_v51 }
  0x6b   :  { %1241 = vmatprep.subr.bf16.mxu1 %v1372_v53 }
  0x6e   :  { %1242 = vmatpush3.bf16.msra.mxu1 %v1372_v53 }
  0x6f   :  { %1243 = vmatprep.subr.bf16.mxu1 %v1373_v54 }
  0x70   :  { %505 = vmatmul.mubr.bf16.gmra.mrb[12].mxu0 %v1330_v34  ;;  %601 = vmatmul.mubr.bf16.gmra.mrb[12].mxu1 %v1366_v36 }
  0x71   :  { %512 = vmatprep.mubr.bf16.mxu0 %v1331_v35 }
  0x72   :  { %1244 = vmatpush3.bf16.msra.mxu1 %v1373_v54 }
  0x73   :  { %1245 = vmatprep.subr.bf16.mxu1 %v1374_v55 }
  0x76   :  { %1246 = vmatpush3.bf16.msra.mxu1 %v1374_v55 }
  0x78   :  { %513 = vmatmul.mubr.bf16.gmra.mrb[16].mxu0 %v1333_v37 }
  0x79   :  { %520 = vmatprep.mubr.bf16.mxu0 %v1334_v38 }
  0x80   :  { %521 = vmatmul.mubr.bf16.gmra.mrb[20].mxu0 %v1336_v39 }
  0x81   :  { %528 = vmatprep.mubr.bf16.mxu0 %v1337_v40 }
  0x88   :  { %529 = vmatmul.mubr.bf16.gmra.mrb[24].mxu0 %v1339_v41 }
  0x89   :  { %536 = vmatprep.mubr.bf16.mxu0 %v1340_v42 }
  0x90   :  { %537 = vmatmul.mubr.bf16.gmra.mrb[28].mxu0 %v1342_v43 }
  0x91   :  { %544 = vmatprep.mubr.bf16.mxu0 %v1343_v44 }
  0x98   :  { %545 = vmatmul.mubr.bf16.gmra.mrb[32].mxu0 %v1345_v45 }
  0x99   :  { %552 = vmatprep.mubr.bf16.mxu0 %v1346_v46 }
  0xa0   :  { %553 = vmatmul.mubr.bf16.gmra.mrb[36].mxu0 %v1348_v47 }
  0xa1   :  { %560 = vmatprep.mubr.bf16.mxu0 %v1352_v48 }
  0xa8   :  { %561 = vmatmul.mubr.bf16.gmra.mrb[40].mxu0 %v1354_v49 }
  0xa9   :  { %568 = vmatprep.mubr.bf16.mxu0 %v1358_v50 }
  0xb0   :  { %569 = vmatmul.mubr.bf16.gmra.mrb[44].mxu0 %v1360_v52 }
 0x12b   :  { %v1111_v56 = vpop.f32.mrb[0].mxu0  ;;  %v1183_v58 = vpop.f32.mrb[0].mxu1 }
 0x12c   :  { %v1112_v57 = vpop.f32.mrb[1].mxu0  ;;  %v1184_v61 = vpop.f32.mrb[1].mxu1 }
 0x12d   :  { %v1113_v59 = vadd.f32 %v1112_v57, %v1111_v56  ;;  %v1114_v60 = vpop.f32.mrb[2].mxu0  ;;  %v1547_v63 = vadd.f32 %v1184_v61, %v1183_v58  ;;  %v1186_v0 = vpop.f32.mrb[2].mxu1 }
 0x12e   :  { %v1115_v62 = vpop.f32.mrb[3].mxu0  ;;  %v1187_v2 = vpop.f32.mrb[3].mxu1 }
 0x12f   :  { %v1116_v1 = vadd.f32 %v1115_v62, %v1114_v60  ;;  %v1549_v3 = vadd.f32 %v1187_v2, %v1186_v0 }
 0x131   :  { %v708_v4 = vpack.c.bf16 %v1116_v1, %v1113_v59  ;;  %v720_v5 = vpack.c.bf16 %v1549_v3, %v1547_v63 }
 0x133   :  { %v1117_v6 = vpop.f32.mrb[4].mxu0  ;;  %1247 = vmatprep.mubr.bf16.mxu1 %v708_v4  ;;  %v1189_v8 = vpop.f32.mrb[4].mxu1 }
 0x134   :  { %v1118_v7 = vpop.f32.mrb[5].mxu0  ;;  %v1190_v11 = vpop.f32.mrb[5].mxu1 }
 0x135   :  { %v1119_v9 = vadd.f32 %v1118_v7, %v1117_v6  ;;  %v1120_v10 = vpop.f32.mrb[6].mxu0  ;;  %v1553_v13 = vadd.f32 %v1190_v11, %v1189_v8  ;;  %v1192_v14 = vpop.f32.mrb[6].mxu1 }
 0x136   :  { %v1121_v12 = vpop.f32.mrb[7].mxu0  ;;  %v1193_v16 = vpop.f32.mrb[7].mxu1 }
 0x137   :  { %v1122_v15 = vadd.f32 %v1121_v12, %v1120_v10  ;;  %v1555_v17 = vadd.f32 %v1193_v16, %v1192_v14 }
 0x139   :  { %v709_v18 = vpack.c.bf16 %v1122_v15, %v1119_v9  ;;  %v721_v19 = vpack.c.bf16 %v1555_v17, %v1553_v13 }
 0x13b   :  { %v1123_v20 = vpop.f32.mrb[8].mxu0  ;;  %1248 = vmatmul.mubr.bf16.vlgmr.msra.gmra.mrb[16].mxu1 %v709_v18  ;;  %v1195_v22 = vpop.f32.mrb[8].mxu1 }
 0x13c   :  { %v1124_v21 = vpop.f32.mrb[9].mxu0  ;;  %v1196_v25 = vpop.f32.mrb[9].mxu1 }
 0x13d   :  { %v1125_v23 = vadd.f32 %v1124_v21, %v1123_v20  ;;  %v1126_v24 = vpop.f32.mrb[10].mxu0  ;;  %v1559_v27 = vadd.f32 %v1196_v25, %v1195_v22  ;;  %v1198_v28 = vpop.f32.mrb[10].mxu1 }
 0x13e   :  { %v1127_v26 = vpop.f32.mrb[11].mxu0  ;;  %v1199_v30 = vpop.f32.mrb[11].mxu1 }
 0x13f   :  { %v1128_v29 = vadd.f32 %v1127_v26, %v1126_v24  ;;  %v1561_v31 = vadd.f32 %v1199_v30, %v1198_v28 }
 0x141   :  { %v710_v32 = vpack.c.bf16 %v1128_v29, %v1125_v23  ;;  %v722_v33 = vpack.c.bf16 %v1561_v31, %v1559_v27 }
 0x143   :  { %v1129_v34 = vpop.f32.mrb[12].mxu0  ;;  %1251 = vmatprep.mubr.bf16.mxu1 %v710_v32  ;;  %v1201_v36 = vpop.f32.mrb[12].mxu1 }
 0x144   :  { %v1130_v35 = vpop.f32.mrb[13].mxu0  ;;  %v1202_v39 = vpop.f32.mrb[13].mxu1 }
 0x145   :  { %v1131_v37 = vadd.f32 %v1130_v35, %v1129_v34  ;;  %v1132_v38 = vpop.f32.mrb[14].mxu0  ;;  %v1565_v41 = vadd.f32 %v1202_v39, %v1201_v36  ;;  %v1204_v42 = vpop.f32.mrb[14].mxu1 }
 0x146   :  { %v1133_v40 = vpop.f32.mrb[15].mxu0  ;;  %v1205_v44 = vpop.f32.mrb[15].mxu1 }
 0x147   :  { %v1134_v43 = vadd.f32 %v1133_v40, %v1132_v38  ;;  %v1567_v45 = vadd.f32 %v1205_v44, %v1204_v42 }
 0x149   :  { %v711_v46 = vpack.c.bf16 %v1134_v43, %v1131_v37  ;;  %v723_v47 = vpack.c.bf16 %v1567_v45, %v1565_v41 }
 0x14b   :  { %v1135_v48 = vpop.f32.mrb[16].mxu0  ;;  %1252 = vmatmul.mubr.bf16.gmra.mrb[20].mxu1 %v711_v46 }
 0x14c   :  { %v1136_v49 = vpop.f32.mrb[17].mxu0 }
 0x14d   :  { %v1137_v50 = vadd.f32 %v1136_v49, %v1135_v48  ;;  %v1138_v51 = vpop.f32.mrb[18].mxu0 }
 0x14e   :  { %v1139_v52 = vpop.f32.mrb[19].mxu0 }
 0x14f   :  { %v1140_v53 = vadd.f32 %v1139_v52, %v1138_v51  ;;  %v1586_v52 = vld [vmem:[%s1638_s3] ss:$0 sm:$0xff]  ;;  %s1476_s3 = smov [#allocation9]  }
 0x150   :  { %s1025_s26 = sshll.u32 %s1476_s3, 4  ;;  %s1026_s26 = int_to_ptr.vmem [resolvable:$true] %s1025_s26 }
 0x151   :  { %v712_v54 = vpack.c.bf16 %v1140_v53, %v1137_v50  ;;  %s1441_s29 = scalar_lea.vmem %s1026_s26, 4096  ;;  %p1446_p11 = scmp.lt.s32.totalorder %s1026_s26, %s1026_s26 }
 0x152   :  { %p1442_p10 = scmp.ne.s32.totalorder %s1026_s26, %s1441_s29  ;;  %p1447_p12 = scmp.lt.s32.totalorder %s1441_s29, %s1441_s29 }
 0x153   :  { %v1141_v55 = vpop.f32.mrb[20].mxu0  ;;  %1255 = vmatprep.mubr.bf16.mxu1 %v712_v54 }
 0x154   :  { %v1142_v56 = vpop.f32.mrb[21].mxu0  ;;  %p1448_p13 = por %p1447_p12, %p1446_p11 }
 0x155   :  { %v1143_v57 = vadd.f32 %v1142_v56, %v1141_v55  ;;  %v1144_v58 = vpop.f32.mrb[22].mxu0 }
 0x156   :  { %v1145_v59 = vpop.f32.mrb[23].mxu0  ;;  %p1449_p0 = pnand %p1448_p13, %p1442_p10 }
 0x157   :  { %v1146_v60 = vadd.f32 %v1145_v59, %v1144_v58 }
 0x159   :  { %v713_v61 = vpack.c.bf16 %v1146_v60, %v1143_v57 }
 0x15b   :  { %v1147_v62 = vpop.f32.mrb[24].mxu0  ;;  %1256 = vmatmul.mubr.bf16.gmra.mrb[24].mxu1 %v713_v61 }
 0x15c   :  { %v1148_v0 = vpop.f32.mrb[25].mxu0 }
 0x15d   :  { %v1149_v1 = vadd.f32 %v1148_v0, %v1147_v62  ;;  %v1150_v2 = vpop.f32.mrb[26].mxu0 }
 0x15e   :  { %v1151_v4 = vpop.f32.mrb[27].mxu0 }
 0x15f   :  { %v1152_v6 = vadd.f32 %v1151_v4, %v1150_v2 }
 0x161   :  { %v714_v7 = vpack.c.bf16 %v1152_v6, %v1149_v1 }
 0x163   :  { %v1153_v8 = vpop.f32.mrb[28].mxu0  ;;  %1259 = vmatprep.mubr.bf16.mxu1 %v714_v7 }
 0x164   :  { %v1154_v9 = vpop.f32.mrb[29].mxu0 }
 0x165   :  { %v1155_v10 = vadd.f32 %v1154_v9, %v1153_v8  ;;  %v1156_v11 = vpop.f32.mrb[30].mxu0 }
 0x166   :  { %v1157_v12 = vpop.f32.mrb[31].mxu0 }
 0x167   :  { %v1158_v14 = vadd.f32 %v1157_v12, %v1156_v11 }
 0x169   :  { %v715_v15 = vpack.c.bf16 %v1158_v14, %v1155_v10 }
 0x16b   :  { %v1159_v16 = vpop.f32.mrb[32].mxu0  ;;  %1260 = vmatmul.mubr.bf16.gmra.mrb[28].mxu1 %v715_v15 }
 0x16c   :  { %v1160_v18 = vpop.f32.mrb[33].mxu0 }
 0x16d   :  { %v1161_v20 = vadd.f32 %v1160_v18, %v1159_v16  ;;  %v1162_v21 = vpop.f32.mrb[34].mxu0 }
 0x16e   :  { %v1163_v22 = vpop.f32.mrb[35].mxu0 }
 0x16f   :  { %v1164_v23 = vadd.f32 %v1163_v22, %v1162_v21 }
 0x171   :  { %v716_v24 = vpack.c.bf16 %v1164_v23, %v1161_v20 }
 0x173   :  { %v1165_v25 = vpop.f32.mrb[36].mxu0  ;;  %1263 = vmatprep.mubr.bf16.mxu1 %v716_v24 }
 0x174   :  { %v1166_v26 = vpop.f32.mrb[37].mxu0 }
 0x175   :  { %v1167_v28 = vadd.f32 %v1166_v26, %v1165_v25  ;;  %v1168_v29 = vpop.f32.mrb[38].mxu0 }
 0x176   :  { %v1169_v30 = vpop.f32.mrb[39].mxu0 }
 0x177   :  { %v1170_v32 = vadd.f32 %v1169_v30, %v1168_v29 }
 0x179   :  { %v717_v34 = vpack.c.bf16 %v1170_v32, %v1167_v28 }
 0x17b   :  { %v1171_v35 = vpop.f32.mrb[40].mxu0  ;;  %1264 = vmatmul.mubr.bf16.gmra.mrb[32].mxu1 %v717_v34 }
 0x17c   :  { %v1172_v36 = vpop.f32.mrb[41].mxu0 }
 0x17d   :  { %v1173_v37 = vadd.f32 %v1172_v36, %v1171_v35  ;;  %v1174_v38 = vpop.f32.mrb[42].mxu0 }
 0x17e   :  { %v1175_v39 = vpop.f32.mrb[43].mxu0 }
 0x17f   :  { %v1176_v40 = vadd.f32 %v1175_v39, %v1174_v38 }
 0x181   :  { %v718_v42 = vpack.c.bf16 %v1176_v40, %v1173_v37 }
 0x183   :  { %v1177_v43 = vpop.f32.mrb[44].mxu0  ;;  %1267 = vmatprep.mubr.bf16.mxu1 %v718_v42 }
 0x184   :  { %v1178_v44 = vpop.f32.mrb[45].mxu0 }
 0x185   :  { %v1179_v46 = vadd.f32 %v1178_v44, %v1177_v43  ;;  %v1180_v48 = vpop.f32.mrb[46].mxu0 }
 0x186   :  { %v1181_v49 = vpop.f32.mrb[47].mxu0 }
 0x187   :  { %v1182_v50 = vadd.f32 %v1181_v49, %v1180_v48 }
 0x189   :  { %v719_v51 = vpack.c.bf16 %v1182_v50, %v1179_v46 }
 0x18b   :  { %1268 = vmatmul.mubr.bf16.gmra.mrb[36].mxu1 %v719_v51 }
 0x18c   :  { %1271 = vmatprep.mubr.bf16.mxu1 %v720_v5 }
 0x193   :  { %1272 = vmatmul.mubr.bf16.gmra.mrb[40].mxu1 %v721_v19 }
 0x194   :  { %1275 = vmatprep.mubr.bf16.mxu1 %v722_v33 }
 0x19b   :  { %1276 = vmatmul.mubr.bf16.gmra.mrb[44].mxu1 %v723_v47 }
 0x20e   :  { %v1249_v53 = vpop.f32.mrb[16].mxu1 }
 0x20f   :  { %v838_v63 = vadd.f32 %v1249_v53, %v1586_v52  ;;  %v829_v3 = vpop.f32.mrb[17].mxu1 }
 0x210   :  { %v830_v5 = vadd.f32 %v1586_v52, %v829_v3  ;;  %v1250_v13 = vpop.f32.mrb[18].mxu1 }
 0x211   :  { %v958_v17 = vmax.f32 %v838_v63, 0.0  ;;  %v841_v19 = vadd.f32 %v1250_v13, %v1586_v52  ;;  %v832_v27 = vpop.f32.mrb[19].mxu1 }
 0x212   :  { %v956_v31 = vmax.f32 %v830_v5, 0.0  ;;  %v833_v33 = vadd.f32 %v1586_v52, %v832_v27 }
 0x213   :  { %990 = vst [vmem:[#allocation9 + $0x10] sm:$0xff] %v958_v17  ;;  %v959_v41 = vmax.f32 %v841_v19, 0.0 }
 0x214   :  { %988 = vst [vmem:[#allocation9] sm:$0xff] %v956_v31  ;;  %v957_v45 = vmax.f32 %v833_v33, 0.0 }
 0x215   :  { %991 = vst [vmem:[#allocation9 + $0x18] sm:$0xff] %v959_v41 }
 0x216   :  { %989 = vst [vmem:[#allocation9 + $0x8] sm:$0xff] %v957_v45 }
 0x21e   :  { %v1253_v47 = vpop.f32.mrb[20].mxu1 }
 0x21f   :  { %v854_v54 = vadd.f32 %v1253_v47, %v1586_v52  ;;  %v845_v55 = vpop.f32.mrb[21].mxu1 }
 0x220   :  { %v846_v56 = vadd.f32 %v1586_v52, %v845_v55  ;;  %v1254_v57 = vpop.f32.mrb[22].mxu1 }
 0x221   :  { %v962_v58 = vmax.f32 %v854_v54, 0.0  ;;  %v857_v59 = vadd.f32 %v1254_v57, %v1586_v52  ;;  %v848_v60 = vpop.f32.mrb[23].mxu1 }
 0x222   :  { %v960_v61 = vmax.f32 %v846_v56, 0.0  ;;  %v849_v62 = vadd.f32 %v1586_v52, %v848_v60 }
 0x223   :  { %994 = vst [vmem:[#allocation9 + $0x30] sm:$0xff] %v962_v58  ;;  %v963_v0 = vmax.f32 %v857_v59, 0.0 }
 0x224   :  { %992 = vst [vmem:[#allocation9 + $0x20] sm:$0xff] %v960_v61  ;;  %v961_v1 = vmax.f32 %v849_v62, 0.0 }
 0x225   :  { %995 = vst [vmem:[#allocation9 + $0x38] sm:$0xff] %v963_v0 }
 0x226   :  { %993 = vst [vmem:[#allocation9 + $0x28] sm:$0xff] %v961_v1 }
 0x22e   :  { %v1257_v2 = vpop.f32.mrb[24].mxu1 }
 0x22f   :  { %v870_v4 = vadd.f32 %v1257_v2, %v1586_v52  ;;  %v861_v6 = vpop.f32.mrb[25].mxu1 }
 0x230   :  { %v862_v7 = vadd.f32 %v1586_v52, %v861_v6  ;;  %v1258_v8 = vpop.f32.mrb[26].mxu1 }
 0x231   :  { %v966_v9 = vmax.f32 %v870_v4, 0.0  ;;  %v873_v10 = vadd.f32 %v1258_v8, %v1586_v52  ;;  %v864_v11 = vpop.f32.mrb[27].mxu1 }
 0x232   :  { %v964_v12 = vmax.f32 %v862_v7, 0.0  ;;  %v865_v14 = vadd.f32 %v1586_v52, %v864_v11 }
 0x233   :  { %998 = vst [vmem:[#allocation9 + $0x50] sm:$0xff] %v966_v9  ;;  %v967_v15 = vmax.f32 %v873_v10, 0.0 }
 0x234   :  { %996 = vst [vmem:[#allocation9 + $0x40] sm:$0xff] %v964_v12  ;;  %v965_v16 = vmax.f32 %v865_v14, 0.0 }
 0x235   :  { %999 = vst [vmem:[#allocation9 + $0x58] sm:$0xff] %v967_v15 }
 0x236   :  { %997 = vst [vmem:[#allocation9 + $0x48] sm:$0xff] %v965_v16 }
 0x23e   :  { %v1261_v18 = vpop.f32.mrb[28].mxu1 }
 0x23f   :  { %v886_v20 = vadd.f32 %v1261_v18, %v1586_v52  ;;  %v877_v21 = vpop.f32.mrb[29].mxu1 }
 0x240   :  { %v878_v22 = vadd.f32 %v1586_v52, %v877_v21  ;;  %v1262_v23 = vpop.f32.mrb[30].mxu1 }
 0x241   :  { %v970_v24 = vmax.f32 %v886_v20, 0.0  ;;  %v889_v25 = vadd.f32 %v1262_v23, %v1586_v52  ;;  %v880_v26 = vpop.f32.mrb[31].mxu1 }
 0x242   :  { %v968_v28 = vmax.f32 %v878_v22, 0.0  ;;  %v881_v29 = vadd.f32 %v1586_v52, %v880_v26 }
 0x243   :  { %1002 = vst [vmem:[#allocation9 + $0x70] sm:$0xff] %v970_v24  ;;  %v971_v30 = vmax.f32 %v889_v25, 0.0 }
 0x244   :  { %1000 = vst [vmem:[#allocation9 + $0x60] sm:$0xff] %v968_v28  ;;  %v969_v32 = vmax.f32 %v881_v29, 0.0 }
 0x245   :  { %1003 = vst [vmem:[#allocation9 + $0x78] sm:$0xff] %v971_v30 }
 0x246   :  { %1001 = vst [vmem:[#allocation9 + $0x68] sm:$0xff] %v969_v32 }
 0x24e   :  { %v1265_v34 = vpop.f32.mrb[32].mxu1 }
 0x24f   :  { %v902_v35 = vadd.f32 %v1265_v34, %v1586_v52  ;;  %v893_v36 = vpop.f32.mrb[33].mxu1 }
 0x250   :  { %v894_v37 = vadd.f32 %v1586_v52, %v893_v36  ;;  %v1266_v38 = vpop.f32.mrb[34].mxu1 }
 0x251   :  { %v974_v39 = vmax.f32 %v902_v35, 0.0  ;;  %v905_v40 = vadd.f32 %v1266_v38, %v1586_v52  ;;  %v896_v42 = vpop.f32.mrb[35].mxu1 }
 0x252   :  { %v972_v43 = vmax.f32 %v894_v37, 0.0  ;;  %v897_v44 = vadd.f32 %v1586_v52, %v896_v42 }
 0x253   :  { %1006 = vst [vmem:[#allocation9 + $0x90] sm:$0xff] %v974_v39  ;;  %v975_v46 = vmax.f32 %v905_v40, 0.0 }
 0x254   :  { %1004 = vst [vmem:[#allocation9 + $0x80] sm:$0xff] %v972_v43  ;;  %v973_v48 = vmax.f32 %v897_v44, 0.0 }
 0x255   :  { %1007 = vst [vmem:[#allocation9 + $0x98] sm:$0xff] %v975_v46 }
 0x256   :  { %1005 = vst [vmem:[#allocation9 + $0x88] sm:$0xff] %v973_v48 }
 0x25e   :  { %v1269_v49 = vpop.f32.mrb[36].mxu1 }
 0x25f   :  { %v918_v50 = vadd.f32 %v1269_v49, %v1586_v52  ;;  %v909_v51 = vpop.f32.mrb[37].mxu1 }
 0x260   :  { %v910_v53 = vadd.f32 %v1586_v52, %v909_v51  ;;  %v1270_v63 = vpop.f32.mrb[38].mxu1 }
 0x261   :  { %v978_v3 = vmax.f32 %v918_v50, 0.0  ;;  %v921_v5 = vadd.f32 %v1270_v63, %v1586_v52  ;;  %v912_v13 = vpop.f32.mrb[39].mxu1 }
 0x262   :  { %v976_v17 = vmax.f32 %v910_v53, 0.0  ;;  %v913_v19 = vadd.f32 %v1586_v52, %v912_v13 }
 0x263   :  { %1010 = vst [vmem:[#allocation9 + $0xb0] sm:$0xff] %v978_v3  ;;  %v979_v27 = vmax.f32 %v921_v5, 0.0 }
 0x264   :  { %1008 = vst [vmem:[#allocation9 + $0xa0] sm:$0xff] %v976_v17  ;;  %v977_v31 = vmax.f32 %v913_v19, 0.0 }
 0x265   :  { %1011 = vst [vmem:[#allocation9 + $0xb8] sm:$0xff] %v979_v27 }
 0x266   :  { %1009 = vst [vmem:[#allocation9 + $0xa8] sm:$0xff] %v977_v31  ;;  %v1273_v33 = vpop.f32.mrb[40].mxu1 }
 0x267   :  { %v934_v41 = vadd.f32 %v1273_v33, %v1586_v52  ;;  %v925_v45 = vpop.f32.mrb[41].mxu1 }
 0x268   :  { %v926_v47 = vadd.f32 %v1586_v52, %v925_v45  ;;  %v1274_v54 = vpop.f32.mrb[42].mxu1 }
 0x269   :  { %v982_v55 = vmax.f32 %v934_v41, 0.0  ;;  %v937_v56 = vadd.f32 %v1274_v54, %v1586_v52  ;;  %v928_v57 = vpop.f32.mrb[43].mxu1 }
 0x26a   :  { %v980_v58 = vmax.f32 %v926_v47, 0.0  ;;  %v929_v59 = vadd.f32 %v1586_v52, %v928_v57 }
 0x26b   :  { %1014 = vst [vmem:[#allocation9 + $0xd0] sm:$0xff] %v982_v55  ;;  %v983_v60 = vmax.f32 %v937_v56, 0.0 }
 0x26c   :  { %1012 = vst [vmem:[#allocation9 + $0xc0] sm:$0xff] %v980_v58  ;;  %v981_v61 = vmax.f32 %v929_v59, 0.0 }
 0x26d   :  { %1015 = vst [vmem:[#allocation9 + $0xd8] sm:$0xff] %v983_v60 }
 0x26e   :  { %1013 = vst [vmem:[#allocation9 + $0xc8] sm:$0xff] %v981_v61  ;;  %v1277_v62 = vpop.f32.mrb[44].mxu1 }
 0x26f   :  { %v950_v0 = vadd.f32 %v1277_v62, %v1586_v52  ;;  %v941_v1 = vpop.f32.mrb[45].mxu1 }
 0x270   :  { %v942_v2 = vadd.f32 %v1586_v52, %v941_v1  ;;  %v1278_v4 = vpop.f32.mrb[46].mxu1 }
 0x271   :  { %v986_v6 = vmax.f32 %v950_v0, 0.0  ;;  %v953_v7 = vadd.f32 %v1278_v4, %v1586_v52  ;;  %v944_v8 = vpop.f32.mrb[47].mxu1 }
 0x272   :  { %v984_v9 = vmax.f32 %v942_v2, 0.0  ;;  %v945_v10 = vadd.f32 %v1586_v52, %v944_v8 }
 0x273   :  { %1018 = vst [vmem:[#allocation9 + $0xf0] sm:$0xff] %v986_v6  ;;  %v987_v11 = vmax.f32 %v953_v7, 0.0 }
 0x274   :  { %1016 = vst [vmem:[#allocation9 + $0xe0] sm:$0xff] %v984_v9  ;;  %v985_v12 = vmax.f32 %v945_v10, 0.0 }
 0x275   :  { %1019 = vst [vmem:[#allocation9 + $0xf8] sm:$0xff] %v987_v11 }
 0x276   :  { %1017 = vst [vmem:[#allocation9 + $0xe8] sm:$0xff] %v985_v12 }
 0x277   :  { %1452 = shalt.err (!%p1449_p0)
}
 0x278   :  { %s1453_s6 = scalar_lea.hbm %s1639_s4, 4096 }
 0x279   :  { %p1454_p1 = scmp.ne.s32.totalorder %s1639_s4, %s1453_s6  ;;  %p1457_p2 = scmp.lt.u32.totalorder %s1453_s6, %s1639_s4 }
 0x27b   :  { %p1459_p3 = pnand %p1457_p2, %p1454_p1 }
 0x27d   :  { %1462 = shalt.err (!%p1459_p3)
}
 0x27e   :  { %1031 = dma.vmem_to_hbm [thread:$0]  %s1026_s26, 4096, %s1639_s4, [#allocation5], %s1473_s1, %s1473_s1, %s1474_s13  }
 0x27f   :  { %1467 = dma.done.wait [#allocation5], 4096  }
 0x280   :  { %1468 = vsyncadd [#allocation5], 4294963200 }
 0x281   :  { %1035 = vsyncpa [#allocation4], 1 }
 0x282   :  { %1036 = vsyncpa [#allocation7], 1 }
 0x283   :  { %1037 = vsyncpa [#allocation5], 1 }

</bundles_post_ra>
